<compile_context>
chip_gen: v7x
topology: tpu7x:2x2x1
jax: 0.10.0
libtpu: 0.0.40
codegen_flags: <defaults>
</compile_context>

<pallas_src>
import jax
import jax.numpy as jnp
from jax.experimental import pallas as pl
from jax.experimental.pallas import tpu as pltpu


_LANE = 128                  # lane width: pad every feature dim to a multiple
_SUBLANE = 16                # bf16 sublane packing: pad batch rows to this
_MAX_TK = 2048               # max K-chunk of layer-0 weight kept in VMEM
_COMPUTE_DTYPE = jnp.bfloat16


def _round_up(x: int, m: int) -> int:
    return ((x + m - 1) // m) * m


def _default_row_tile() -> int:
    """Bigger activation row tiles on 128-MiB VMEM chips (v5e/v6e), smaller on v7x."""
    try:
        if pltpu.get_tpu_info().vmem_capacity_bytes >= (100 << 20):
            return 512
    except Exception:
        pass
    return 256


# ----------------------------------------------------------------------------- kernel
def _make_fused_dense_kernel(relu_flags, compute_dtype):
    """Whole DenseBlock in one kernel: layer 0 K-tiled, remaining layers fused."""
    n_layers = len(relu_flags)

    def kernel(x_ref, *rest):
        # rest = (w0, b0, w1, b1, ..., w_{n-1}, b_{n-1}, o_ref, acc_ref)
        o_ref, acc_ref = rest[-2], rest[-1]
        k = pl.program_id(1)

        @pl.when(k == 0)
        def _init():
            acc_ref[...] = jnp.zeros_like(acc_ref)

        # Layer 0: bf16 MXU operands, f32 accumulation into VMEM scratch.
        acc_ref[...] += jnp.dot(x_ref[...], rest[0][...],
                                preferred_element_type=jnp.float32)

        @pl.when(k == pl.num_programs(1) - 1)
        def _finalize():
            h = acc_ref[...] + rest[1][...]            # f32 bias add
            if relu_flags[0]:
                h = jnp.maximum(h, 0.0)
            for li in range(1, n_layers):
                w_ref, b_ref = rest[2 * li], rest[2 * li + 1]
                h = jnp.dot(h.astype(compute_dtype), w_ref[...],
                            preferred_element_type=jnp.float32)
                h = h + b_ref[...]
                if relu_flags[li]:
                    h = jnp.maximum(h, 0.0)
            o_ref[...] = h.astype(o_ref.dtype)         # lane-dense (TB, OUTp) store

    return kernel


# ----------------------------------------------------------------------------- wrapper
def fused_dense_block(h0, weights_p, biases_p, relu_flags, *,
                      max_row_tile=None, max_k_tile=_MAX_TK):
    """Run the full Linear(+ReLU) chain in ONE pallas_call.

    h0         : (B, F0) un-padded activations (feature on the lane axis)
    weights_p  : zero-padded 128-aligned bf16 weights [(F0p,H1p), (H1p,H2p), ...]
    biases_p   : zero-padded (1, Fout_p) f32 biases
    relu_flags : ReLU applied after layer l iff relu_flags[l]
    Returns (B, Fout_last_p); caller slices the logical output columns.
    """
    B, F0 = h0.shape
    F0p, H1p = weights_p[0].shape
    OUTp = weights_p[-1].shape[1]
    if max_row_tile is None:
        max_row_tile = _default_row_tile()

    # ---- adaptive row tiling (minimal padding waste) ----
    if B <= max_row_tile:
        TB = _round_up(B, _SUBLANE)
        Bp = TB
    else:
        n_tiles = -(-B // max_row_tile)
        TB = _round_up(-(-B // n_tiles), _SUBLANE)
        Bp = n_tiles * TB

    # ---- K tiling for layer 0 (tk divides F0p; both are multiples of 128) ----
    tk = max(_LANE, (min(F0p, max_k_tile) // _LANE) * _LANE)
    while F0p % tk:
        tk -= _LANE
    nk = F0p // tk

    hp = jnp.pad(h0, ((0, Bp - B), (0, F0p - F0))).astype(_COMPUTE_DTYPE)
    grid = (Bp // TB, nk)

    flops = sum(2 * Bp * w.shape[0] * w.shape[1] for w in weights_p)
    bytes_accessed = (hp.size * 2
                      + sum(w.size * 2 for w in weights_p)
                      + sum(b.size * 4 for b in biases_p)
                      + Bp * OUTp * 4)

    def run(single_buffer_weights: bool):
        # Constant-index weights/biases are fetched once; single-buffer them to
        # halve their VMEM allocation (default BlockSpec pipelining uses 2).
        const_kwargs = ({"pipeline_mode": pl.Buffered(1)}
                        if single_buffer_weights else {})
        in_specs = [
            pl.BlockSpec((TB, tk), lambda i, k: (i, k)),       # activations
            pl.BlockSpec((tk, H1p), lambda i, k: (k, 0)),      # W0, K-streamed
            pl.BlockSpec(biases_p[0].shape, lambda i, k: (0, 0), **const_kwargs),
        ]
        operands = [hp, weights_p[0], biases_p[0]]
        for w, b in zip(weights_p[1:], biases_p[1:]):
            in_specs.append(pl.BlockSpec(w.shape, lambda i, k: (0, 0), **const_kwargs))
            in_specs.append(pl.BlockSpec(b.shape, lambda i, k: (0, 0), **const_kwargs))
            operands += [w, b]

        # VMEM budget: double-buffered streamed blocks + resident weights +
        # f32 accumulator scratch + slack for intermediates.  Clamp to the v7x
        # 64 MiB physical ceiling (v5e/v6e have 128 MiB and are always safe).
        wbc = 1 if single_buffer_weights else 2
        est = (2 * TB * tk * 2                       # activation tile (bf16)
               + 2 * tk * H1p * 2                    # W0 chunk (bf16)
               + wbc * sum(w.size * 2 for w in weights_p[1:])
               + wbc * sum(b.size * 4 for b in biases_p)
               + 2 * TB * OUTp * 4                   # output tile (f32)
               + TB * H1p * 4                        # accumulator scratch
               + 4 * TB * max(w.shape[1] for w in weights_p) * 4)
        vmem_limit = int(min(max(2 * est, 32 << 20), 64 << 20))

        return pl.pallas_call(
            _make_fused_dense_kernel(tuple(relu_flags), _COMPUTE_DTYPE),
            out_shape=jax.ShapeDtypeStruct((Bp, OUTp), jnp.float32),
            grid=grid,
            in_specs=in_specs,
            out_specs=pl.BlockSpec((TB, OUTp), lambda i, k: (i, 0)),
            scratch_shapes=[pltpu.VMEM((TB, H1p), jnp.float32)],
            compiler_params=pltpu.CompilerParams(
                dimension_semantics=("parallel", "arbitrary"),
                vmem_limit_bytes=vmem_limit),
            cost_estimate=pl.CostEstimate(
                flops=flops, transcendentals=0, bytes_accessed=bytes_accessed),
        )(*operands)

    try:
        out = run(True)
    except Exception:
        # pipeline_mode=pl.Buffered(1) rejected on this jax/backend -> default buffering.
        out = run(False)
    return out[:B]


# ----------------------------------------------------------------------------- module
class DsFCN:
    """JAX/Pallas port of eugene dsFCN: revcomp -> flatten -> aggr -> DenseBlock."""

    def __init__(self, input_len: int, output_dim: int, input_dims: int = 4,
                 aggr: str = "concat", dense_kwargs: dict = {},
                 max_row_tile=None, max_k_tile: int = _MAX_TK):
        if aggr not in ("concat", "max", "avg"):
            raise ValueError(
                f"Invalid aggr, must be one of ['concat', 'max', 'avg'], got {aggr}.")
        self.input_len = input_len
        self.input_dims = input_dims
        self.output_dim = output_dim
        self.aggr = aggr
        self.flattened_input_dims = input_len * input_dims
        self.max_row_tile = max_row_tile
        self.max_k_tile = max_k_tile

        dense_in = (self.flattened_input_dims * 2 if aggr == "concat"
                    else self.flattened_input_dims)
        hidden_dims = list(dense_kwargs.get("hidden_dims", []))
        dims = [dense_in] + hidden_dims + [output_dim]
        # ReLU after every layer except the last (eugene DenseBlock default).
        self.relu_flags = [True] * (len(dims) - 2) + [False]

        # Deterministic synthetic parameter init (not a checkpoint load).
        key = jax.random.PRNGKey(0)
        self.params = []          # logical f32 (W:(d_in,d_out), b:(d_out,)) for reference
        self.params_padded = []   # zero-padded, 128-aligned; W in bf16, b in f32
        for d_in, d_out in zip(dims[:-1], dims[1:]):
            key, kw, kb = jax.random.split(key, 3)
            scale = 1.0 / jnp.sqrt(jnp.float32(d_in))
            w = (jax.random.uniform(kw, (d_in, d_out), jnp.float32) * 2.0 - 1.0) * scale
            b = (jax.random.uniform(kb, (d_out,), jnp.float32) * 2.0 - 1.0) * scale
            self.params.append((w, b))
            d_in_p = _round_up(d_in, _LANE)
            d_out_p = _round_up(d_out, _LANE)
            wp = (jnp.zeros((d_in_p, d_out_p), jnp.float32)
                  .at[:d_in, :d_out].set(w).astype(_COMPUTE_DTYPE))
            bp = jnp.zeros((1, d_out_p), jnp.float32).at[0, :d_out].set(b)
            self.params_padded.append((wp, bp))

    # ---- fused dense block (single kernel launch) ----
    def _dense(self, h: jax.Array) -> jax.Array:
        ws = [w for w, _ in self.params_padded]
        bs = [b for _, b in self.params_padded]
        out_p = fused_dense_block(h, ws, bs, self.relu_flags,
                                  max_row_tile=self.max_row_tile,
                                  max_k_tile=self.max_k_tile)
        return out_p[:, : self.output_dim]

    def __call__(self, x: jax.Array) -> jax.Array:
        # x: (B, input_dims, input_len) NCL one-hot, identical to the torch module.
        B = x.shape[0]
        x_flat = x.reshape(B, self.flattened_input_dims)
        x_rc_flat = jnp.flip(x, axis=(1, 2)).reshape(B, self.flattened_input_dims)
        if self.aggr == "concat":
            return self._dense(jnp.concatenate([x_flat, x_rc_flat], axis=1))
        # max / avg: both strands through the same dense block in ONE kernel
        # launch by stacking them along the batch axis.
        stacked = jnp.concatenate([x_flat, x_rc_flat], axis=0)
        y = self._dense(stacked)
        y_fwd, y_rc = y[:B], y[B:]
        if self.aggr == "max":
            return jnp.maximum(y_fwd, y_rc)
        return (y_fwd + y_rc) * 0.5

    # ---- pure-JAX f32 reference for correctness checking ----
    def reference(self, x: jax.Array) -> jax.Array:
        B = x.shape[0]
        x_flat = x.reshape(B, self.flattened_input_dims)
        x_rc_flat = jnp.flip(x, axis=(1, 2)).reshape(B, self.flattened_input_dims)

        def dense(h):
            for (w, b), relu in zip(self.params, self.relu_flags):
                h = h @ w + b[None, :]
                if relu:
                    h = jnp.maximum(h, 0.0)
            return h

        if self.aggr == "concat":
            return dense(jnp.concatenate([x_flat, x_rc_flat], axis=1))
        y_fwd, y_rc = dense(x_flat), dense(x_rc_flat)
        if self.aggr == "max":
            return jnp.maximum(y_fwd, y_rc)
        return (y_fwd + y_rc) * 0.5


# ----------------------------------------------------------------------------- main
if __name__ == "__main__":
    # Test 1: canonical small shapes, aggr='concat' (single K step, single row tile).
    B, C, L, OUT = 2, 4, 8, 5
    model = DsFCN(input_len=L, output_dim=OUT, input_dims=C,
                  aggr="concat", dense_kwargs={"hidden_dims": [32]})
    key = jax.random.PRNGKey(0)
    idx = jax.random.randint(key, (B, L), 0, C)
    x = jax.nn.one_hot(idx, C, dtype=jnp.float32).transpose(0, 2, 1)  # (B, C, L)

    out = jax.block_until_ready(model(x))
    ref = model.reference(x)
    assert out.shape == (B, OUT), out.shape
    # bf16 MXU operands with f32 accumulation -> relaxed tolerance vs. f32 reference.
    assert jnp.allclose(out, ref, atol=2e-2, rtol=2e-2), "mismatch vs reference (test 1)"

    # Test 2: exercises the K-tiled layer 0, multiple row tiles, and aggr='max'.
    B2, L2, OUT2 = 20, 64, 3
    model2 = DsFCN(input_len=L2, output_dim=OUT2, input_dims=C,
                   aggr="max", dense_kwargs={"hidden_dims": [48]},
                   max_row_tile=16, max_k_tile=128)
    key2 = jax.random.PRNGKey(1)
    idx2 = jax.random.randint(key2, (B2, L2), 0, C)
    x2 = jax.nn.one_hot(idx2, C, dtype=jnp.float32).transpose(0, 2, 1)

    out2 = jax.block_until_ready(model2(x2))
    ref2 = model2.reference(x2)
    assert out2.shape == (B2, OUT2), out2.shape
    assert jnp.allclose(out2, ref2, atol=2e-2, rtol=2e-2), "mismatch vs reference (test 2)"

    print("KERNEL_OK")
</pallas_src>

<mosaic_0001>
module attributes {stable_mosaic.version = 11 : i64} {
  func.func @kernel(%arg0: i32, %arg1: i32, %arg2: memref<16x128xbf16, #tpu.memory_space<vmem>>, %arg3: memref<128x128xbf16, #tpu.memory_space<vmem>>, %arg4: memref<1x128xf32, #tpu.memory_space<vmem>>, %arg5: memref<128x128xbf16, #tpu.memory_space<vmem>>, %arg6: memref<1x128xf32, #tpu.memory_space<vmem>>, %arg7: memref<16x128xf32, #tpu.memory_space<vmem>>, %arg8: memref<16x128xf32, #tpu.memory_space<vmem>>) attributes {dimension_semantics = [#tpu.dimension_semantics<parallel>, #tpu.dimension_semantics<arbitrary>], iteration_bounds = array<i64: 1, 1>, scalar_prefetch = 0 : i64, scratch_operands = 1 : i64, tpu.core_type = #tpu.core_type<tc>, window_params = [{transform_indices = @transform_0, window_bounds = array<i64: 16, 128>}, {transform_indices = @transform_1, window_bounds = array<i64: 128, 128>}, {pipeline_mode = #tpu.pipeline_mode<synchronous>, transform_indices = @transform_2, window_bounds = array<i64: 1, 128>}, {pipeline_mode = #tpu.pipeline_mode<synchronous>, transform_indices = @transform_3, window_bounds = array<i64: 128, 128>}, {pipeline_mode = #tpu.pipeline_mode<synchronous>, transform_indices = @transform_4, window_bounds = array<i64: 1, 128>}, {transform_indices = @transform_5, window_bounds = array<i64: 16, 128>}]} {
    %c0_i32 = arith.constant 0 : i32
    %0 = arith.cmpi eq, %arg1, %c0_i32 : i32
    %1 = arith.extui %0 : i1 to i32
    %c0_i32_0 = arith.constant 0 : i32
    %2 = arith.cmpi ne, %1, %c0_i32_0 : i32
    scf.if %2 {
      %cst_10 = arith.constant 0.000000e+00 : f32
      %12 = vector.broadcast %cst_10 : f32 to vector<16x128xf32>
      %c0_11 = arith.constant 0 : index
      %c0_12 = arith.constant 0 : index
      %13 = vector.load %arg8[%c0_11, %c0_12] : memref<16x128xf32, #tpu.memory_space<vmem>>, vector<16x128xf32>
      tpu.vector_store %arg8[%c0_11, %c0_12], %12 {strides = array<i32>} : memref<16x128xf32, #tpu.memory_space<vmem>>, vector<16x128xf32>,
    } else {
    }
    %c0 = arith.constant 0 : index
    %c0_1 = arith.constant 0 : index
    %3 = vector.load %arg8[%c0, %c0_1] : memref<16x128xf32, #tpu.memory_space<vmem>>, vector<16x128xf32>
    %c0_2 = arith.constant 0 : index
    %c0_3 = arith.constant 0 : index
    %4 = vector.load %arg2[%c0_2, %c0_3] : memref<16x128xbf16, #tpu.memory_space<vmem>>, vector<16x128xbf16>
    %c0_4 = arith.constant 0 : index
    %c0_5 = arith.constant 0 : index
    %5 = vector.load %arg3[%c0_4, %c0_5] : memref<128x128xbf16, #tpu.memory_space<vmem>>, vector<128x128xbf16>
    %cst = arith.constant dense<0.000000e+00> : vector<16x128xf32>
    %6 = tpu.matmul %4, %5, %cst {dimension_numbers = #tpu.dot_dimension_numbers<[1], [0], [0], [1], [0, 0, 1, 1], [], []>} : vector<16x128xbf16>, vector<128x128xbf16>, vector<16x128xf32> -> vector<16x128xf32>
    %7 = arith.addf %3, %6 : vector<16x128xf32>
    %c0_6 = arith.constant 0 : index
    %c0_7 = arith.constant 0 : index
    %8 = vector.load %arg8[%c0_6, %c0_7] : memref<16x128xf32, #tpu.memory_space<vmem>>, vector<16x128xf32>
    tpu.vector_store %arg8[%c0_6, %c0_7], %7 {strides = array<i32>} : memref<16x128xf32, #tpu.memory_space<vmem>>, vector<16x128xf32>,
    %c0_i32_8 = arith.constant 0 : i32
    %9 = arith.cmpi eq, %arg1, %c0_i32_8 : i32
    %10 = arith.extui %9 : i1 to i32
    %c0_i32_9 = arith.constant 0 : i32
    %11 = arith.cmpi ne, %10, %c0_i32_9 : i32
    scf.if %11 {
      %c0_10 = arith.constant 0 : index
      %c0_11 = arith.constant 0 : index
      %12 = vector.load %arg8[%c0_10, %c0_11] : memref<16x128xf32, #tpu.memory_space<vmem>>, vector<16x128xf32>
      %c0_12 = arith.constant 0 : index
      %c0_13 = arith.constant 0 : index
      %13 = vector.load %arg4[%c0_12, %c0_13] : memref<1x128xf32, #tpu.memory_space<vmem>>, vector<1x128xf32>
      %14 = vector.broadcast %13 : vector<1x128xf32> to vector<16x128xf32>
      %15 = arith.addf %12, %14 : vector<16x128xf32>
      %cst_14 = arith.constant 0.000000e+00 : f32
      %16 = vector.broadcast %cst_14 : f32 to vector<16x128xf32>
      %17 = arith.maximumf %15, %16 : vector<16x128xf32>
      %18 = arith.truncf %17 : vector<16x128xf32> to vector<16x128xbf16>
      %c0_15 = arith.constant 0 : index
      %c0_16 = arith.constant 0 : index
      %19 = vector.load %arg5[%c0_15, %c0_16] : memref<128x128xbf16, #tpu.memory_space<vmem>>, vector<128x128xbf16>
      %cst_17 = arith.constant dense<0.000000e+00> : vector<16x128xf32>
      %20 = tpu.matmul %18, %19, %cst_17 {dimension_numbers = #tpu.dot_dimension_numbers<[1], [0], [0], [1], [0, 0, 1, 1], [], []>} : vector<16x128xbf16>, vector<128x128xbf16>, vector<16x128xf32> -> vector<16x128xf32>
      %c0_18 = arith.constant 0 : index
      %c0_19 = arith.constant 0 : index
      %21 = vector.load %arg6[%c0_18, %c0_19] : memref<1x128xf32, #tpu.memory_space<vmem>>, vector<1x128xf32>
      %22 = vector.broadcast %21 : vector<1x128xf32> to vector<16x128xf32>
      %23 = arith.addf %20, %22 : vector<16x128xf32>
      %c0_20 = arith.constant 0 : index
      %c0_21 = arith.constant 0 : index
      %24 = vector.load %arg7[%c0_20, %c0_21] : memref<16x128xf32, #tpu.memory_space<vmem>>, vector<16x128xf32>
      tpu.vector_store %arg7[%c0_20, %c0_21], %23 {strides = array<i32>} : memref<16x128xf32, #tpu.memory_space<vmem>>, vector<16x128xf32>,
    } else {
    }
    return
  }
  func.func @transform_0(%arg0: i32, %arg1: i32) -> (i32, i32) {
    %c0_i32 = arith.constant 0 : i32
    return %arg0, %arg1 : i32, i32
  }
  func.func @transform_1(%arg0: i32, %arg1: i32) -> (i32, i32) {
    %c0_i32 = arith.constant 0 : i32
    %c0_i32_0 = arith.constant 0 : i32
    return %arg1, %c0_i32 : i32, i32
  }
  func.func @transform_2(%arg0: i32, %arg1: i32) -> (i32, i32) {
    %c0_i32 = arith.constant 0 : i32
    %c0_i32_0 = arith.constant 0 : i32
    %c0_i32_1 = arith.constant 0 : i32
    return %c0_i32, %c0_i32_0 : i32, i32
  }
  func.func @transform_3(%arg0: i32, %arg1: i32) -> (i32, i32) {
    %c0_i32 = arith.constant 0 : i32
    %c0_i32_0 = arith.constant 0 : i32
    %c0_i32_1 = arith.constant 0 : i32
    return %c0_i32, %c0_i32_0 : i32, i32
  }
  func.func @transform_4(%arg0: i32, %arg1: i32) -> (i32, i32) {
    %c0_i32 = arith.constant 0 : i32
    %c0_i32_0 = arith.constant 0 : i32
    %c0_i32_1 = arith.constant 0 : i32
    return %c0_i32, %c0_i32_0 : i32, i32
  }
  func.func @transform_5(%arg0: i32, %arg1: i32) -> (i32, i32) {
    %c0_i32 = arith.constant 0 : i32
    %c0_i32_0 = arith.constant 0 : i32
    return %arg0, %c0_i32 : i32, i32
  }
}

module attributes {stable_mosaic.version = 11 : i64} {
  func.func @kernel(%arg0: i32, %arg1: i32, %arg2: memref<16x128xbf16, #tpu.memory_space<vmem>>, %arg3: memref<128x128xbf16, #tpu.memory_space<vmem>>, %arg4: memref<1x128xf32, #tpu.memory_space<vmem>>, %arg5: memref<128x128xbf16, #tpu.memory_space<vmem>>, %arg6: memref<1x128xf32, #tpu.memory_space<vmem>>, %arg7: memref<16x128xf32, #tpu.memory_space<vmem>>, %arg8: memref<16x128xf32, #tpu.memory_space<vmem>>) attributes {dimension_semantics = [#tpu.dimension_semantics<parallel>, #tpu.dimension_semantics<arbitrary>], iteration_bounds = array<i64: 1, 1>, scalar_prefetch = 0 : i64, scratch_operands = 1 : i64, tpu.core_type = #tpu.core_type<tc>, window_params = [{transform_indices = @transform_0, window_bounds = array<i64: 16, 128>}, {transform_indices = @transform_1, window_bounds = array<i64: 128, 128>}, {pipeline_mode = #tpu.pipeline_mode<synchronous>, transform_indices = @transform_2, window_bounds = array<i64: 1, 128>}, {pipeline_mode = #tpu.pipeline_mode<synchronous>, transform_indices = @transform_3, window_bounds = array<i64: 128, 128>}, {pipeline_mode = #tpu.pipeline_mode<synchronous>, transform_indices = @transform_4, window_bounds = array<i64: 1, 128>}, {transform_indices = @transform_5, window_bounds = array<i64: 16, 128>}]} {
    %c0_i32 = arith.constant 0 : i32
    %0 = arith.cmpi eq, %arg1, %c0_i32 : i32
    %1 = arith.extui %0 : i1 to i32
    %c0_i32_0 = arith.constant 0 : i32
    %2 = arith.cmpi ne, %1, %c0_i32_0 : i32
    scf.if %2 {
      %cst_10 = arith.constant 0.000000e+00 : f32
      %12 = vector.broadcast %cst_10 : f32 to vector<16x128xf32>
      %c0_11 = arith.constant 0 : index
      %c0_12 = arith.constant 0 : index
      %13 = vector.load %arg8[%c0_11, %c0_12] : memref<16x128xf32, #tpu.memory_space<vmem>>, vector<16x128xf32>
      tpu.vector_store %arg8[%c0_11, %c0_12], %12 {strides = array<i32>} : memref<16x128xf32, #tpu.memory_space<vmem>>, vector<16x128xf32>,
    } else {
    }
    %c0 = arith.constant 0 : index
    %c0_1 = arith.constant 0 : index
    %3 = vector.load %arg8[%c0, %c0_1] : memref<16x128xf32, #tpu.memory_space<vmem>>, vector<16x128xf32>
    %c0_2 = arith.constant 0 : index
    %c0_3 = arith.constant 0 : index
    %4 = vector.load %arg2[%c0_2, %c0_3] : memref<16x128xbf16, #tpu.memory_space<vmem>>, vector<16x128xbf16>
    %c0_4 = arith.constant 0 : index
    %c0_5 = arith.constant 0 : index
    %5 = vector.load %arg3[%c0_4, %c0_5] : memref<128x128xbf16, #tpu.memory_space<vmem>>, vector<128x128xbf16>
    %cst = arith.constant dense<0.000000e+00> : vector<16x128xf32>
    %6 = tpu.matmul %4, %5, %cst {dimension_numbers = #tpu.dot_dimension_numbers<[1], [0], [0], [1], [0, 0, 1, 1], [], []>} : vector<16x128xbf16>, vector<128x128xbf16>, vector<16x128xf32> -> vector<16x128xf32>
    %7 = arith.addf %3, %6 : vector<16x128xf32>
    %c0_6 = arith.constant 0 : index
    %c0_7 = arith.constant 0 : index
    %8 = vector.load %arg8[%c0_6, %c0_7] : memref<16x128xf32, #tpu.memory_space<vmem>>, vector<16x128xf32>
    tpu.vector_store %arg8[%c0_6, %c0_7], %7 {strides = array<i32>} : memref<16x128xf32, #tpu.memory_space<vmem>>, vector<16x128xf32>,
    %c0_i32_8 = arith.constant 0 : i32
    %9 = arith.cmpi eq, %arg1, %c0_i32_8 : i32
    %10 = arith.extui %9 : i1 to i32
    %c0_i32_9 = arith.constant 0 : i32
    %11 = arith.cmpi ne, %10, %c0_i32_9 : i32
    scf.if %11 {
      %c0_10 = arith.constant 0 : index
      %c0_11 = arith.constant 0 : index
      %12 = vector.load %arg8[%c0_10, %c0_11] : memref<16x128xf32, #tpu.memory_space<vmem>>, vector<16x128xf32>
      %c0_12 = arith.constant 0 : index
      %c0_13 = arith.constant 0 : index
      %13 = vector.load %arg4[%c0_12, %c0_13] : memref<1x128xf32, #tpu.memory_space<vmem>>, vector<1x128xf32>
      %14 = vector.broadcast %13 : vector<1x128xf32> to vector<16x128xf32>
      %15 = arith.addf %12, %14 : vector<16x128xf32>
      %cst_14 = arith.constant 0.000000e+00 : f32
      %16 = vector.broadcast %cst_14 : f32 to vector<16x128xf32>
      %17 = arith.maximumf %15, %16 : vector<16x128xf32>
      %18 = arith.truncf %17 : vector<16x128xf32> to vector<16x128xbf16>
      %c0_15 = arith.constant 0 : index
      %c0_16 = arith.constant 0 : index
      %19 = vector.load %arg5[%c0_15, %c0_16] : memref<128x128xbf16, #tpu.memory_space<vmem>>, vector<128x128xbf16>
      %cst_17 = arith.constant dense<0.000000e+00> : vector<16x128xf32>
      %20 = tpu.matmul %18, %19, %cst_17 {dimension_numbers = #tpu.dot_dimension_numbers<[1], [0], [0], [1], [0, 0, 1, 1], [], []>} : vector<16x128xbf16>, vector<128x128xbf16>, vector<16x128xf32> -> vector<16x128xf32>
      %c0_18 = arith.constant 0 : index
      %c0_19 = arith.constant 0 : index
      %21 = vector.load %arg6[%c0_18, %c0_19] : memref<1x128xf32, #tpu.memory_space<vmem>>, vector<1x128xf32>
      %22 = vector.broadcast %21 : vector<1x128xf32> to vector<16x128xf32>
      %23 = arith.addf %20, %22 : vector<16x128xf32>
      %c0_20 = arith.constant 0 : index
      %c0_21 = arith.constant 0 : index
      %24 = vector.load %arg7[%c0_20, %c0_21] : memref<16x128xf32, #tpu.memory_space<vmem>>, vector<16x128xf32>
      tpu.vector_store %arg7[%c0_20, %c0_21], %23 {strides = array<i32>} : memref<16x128xf32, #tpu.memory_space<vmem>>, vector<16x128xf32>,
    } else {
    }
    return
  }
  func.func @transform_0(%arg0: i32, %arg1: i32) -> (i32, i32) {
    %c0_i32 = arith.constant 0 : i32
    return %arg0, %arg1 : i32, i32
  }
  func.func @transform_1(%arg0: i32, %arg1: i32) -> (i32, i32) {
    %c0_i32 = arith.constant 0 : i32
    %c0_i32_0 = arith.constant 0 : i32
    return %arg1, %c0_i32 : i32, i32
  }
  func.func @transform_2(%arg0: i32, %arg1: i32) -> (i32, i32) {
    %c0_i32 = arith.constant 0 : i32
    %c0_i32_0 = arith.constant 0 : i32
    %c0_i32_1 = arith.constant 0 : i32
    return %c0_i32, %c0_i32_0 : i32, i32
  }
  func.func @transform_3(%arg0: i32, %arg1: i32) -> (i32, i32) {
    %c0_i32 = arith.constant 0 : i32
    %c0_i32_0 = arith.constant 0 : i32
    %c0_i32_1 = arith.constant 0 : i32
    return %c0_i32, %c0_i32_0 : i32, i32
  }
  func.func @transform_4(%arg0: i32, %arg1: i32) -> (i32, i32) {
    %c0_i32 = arith.constant 0 : i32
    %c0_i32_0 = arith.constant 0 : i32
    %c0_i32_1 = arith.constant 0 : i32
    return %c0_i32, %c0_i32_0 : i32, i32
  }
  func.func @transform_5(%arg0: i32, %arg1: i32) -> (i32, i32) {
    %c0_i32 = arith.constant 0 : i32
    %c0_i32_0 = arith.constant 0 : i32
    return %arg0, %c0_i32 : i32, i32
  }
}

</mosaic_0001>

<bundles_post_ra>
// kernel: tpu_custom_call.1
= control target key start
LH: loop header
LB: loop body
LE: loop exit
PB: predicated region body
PF: predicated region fallthrough
CT: control target
= control target key end

     0   :  { %10 = vsyncpa [#allocation4], 0  ;;  %s645_s0 = inlined_call_operand.hbm [shape: bf16[16,128], index: 0, kind: input, shape index: {}]   ;;  %s646_s1 = inlined_call_operand.hbm [shape: bf16[128,128], index: 1, kind: input, shape index: {}]   ;;  %s647_s2 = inlined_call_operand.vmem [shape: f32[1,128], index: 2, kind: input, shape index: {}]   ;;  %s648_s3 = inlined_call_operand.hbm [shape: bf16[128,128], index: 3, kind: input, shape index: {}]   ;;  %s649_s4 = inlined_call_operand.vmem [shape: f32[1,128], index: 4, kind: input, shape index: {}]   ;;  %s650_s5 = inlined_call_operand.hbm [shape: f32[16,128], index: 5, kind: output, shape index: {}]  }
   0x1   :  { %11 = vsyncpa [#allocation7], 0 }
   0x2   :  { %12 = vsyncpa [#allocation5], 0  ;;  %s535_s18 = smov [#allocation6]   ;;  %s536_s20 = smov [#allocation3]  }
   0x3   :  { %s30_s19 = sshll.u32 %s535_s18, 4  ;;  %s18_s21 = sshll.u32 %s536_s20, 4  ;;  %s31_s19 = int_to_ptr.vmem [resolvable:$true] %s30_s19  ;;  %s575_s21 = int_to_ptr.vmem [resolvable:$true] %s18_s21 }
   0x4   :  { %s441_s24 = scalar_lea.hbm %s646_s1, 1024 }
   0x5   :  { %p442_p0 = scmp.ne.s32.totalorder %s646_s1, %s441_s24  ;;  %p445_p1 = scmp.lt.u32.totalorder %s441_s24, %s646_s1 }
   0x7   :  { %p447_p2 = pnand %p445_p1, %p442_p0 }
   0x9   :  { %450 = shalt.err (!%p447_p2)
}
   0xa   :  { %s451_s29 = scalar_lea.vmem %s31_s19, 1024  ;;  %p456_p4 = scmp.lt.s32.totalorder %s31_s19, %s31_s19 }
   0xb   :  { %p452_p3 = scmp.ne.s32.totalorder %s31_s19, %s451_s29  ;;  %p457_p5 = scmp.lt.s32.totalorder %s451_s29, %s451_s29 }
   0xd   :  { %p458_p6 = por %p457_p5, %p456_p4 }
   0xf   :  { %p459_p7 = pnand %p458_p6, %p452_p3 }
  0x11   :  { %462 = shalt.err (!%p459_p7)
}
  0x12   :  { %s537_s30 = smov 64   ;;  %s538_s6 = smov 4  }
  0x13   :  { %36 = dma.hbm_to_vmem [thread:$0]  %s646_s1, 1024, %s31_s19, [#allocation7], %s537_s30, %s537_s30, %s538_s6  }
  0x14   :  { %s463_s11 = scalar_lea.hbm %s645_s0, 128 }
  0x15   :  { %p464_p8 = scmp.ne.s32.totalorder %s645_s0, %s463_s11  ;;  %p467_p9 = scmp.lt.u32.totalorder %s463_s11, %s645_s0 }
  0x17   :  { %p469_p10 = pnand %p467_p9, %p464_p8 }
  0x19   :  { %472 = shalt.err (!%p469_p10)
}
  0x1a   :  { %s473_s16 = scalar_lea.vmem %s575_s21, 128  ;;  %p478_p12 = scmp.lt.s32.totalorder %s575_s21, %s575_s21 }
  0x1b   :  { %p474_p11 = scmp.ne.s32.totalorder %s575_s21, %s473_s16  ;;  %p479_p13 = scmp.lt.s32.totalorder %s473_s16, %s473_s16 }
  0x1d   :  { %p480_p0 = por %p479_p13, %p478_p12 }
  0x1f   :  { %p481_p1 = pnand %p480_p0, %p474_p11 }
  0x21   :  { %484 = shalt.err (!%p481_p1)
}
  0x22   :  { %24 = dma.hbm_to_vmem [thread:$0]  %s645_s0, 128, %s575_s21, [#allocation4], %s537_s30, %s537_s30, %s538_s6  }
  0x23   :  { %s539_s18 = smov [#allocation8]   ;;  %s485_s23 = scalar_lea.hbm %s648_s3, 1024 }
  0x24   :  { %s44_s19 = sshll.u32 %s539_s18, 4  ;;  %p486_p2 = scmp.ne.s32.totalorder %s648_s3, %s485_s23  ;;  %s45_s19 = int_to_ptr.vmem [resolvable:$true] %s44_s19 }
  0x25   :  { %p489_p3 = scmp.lt.u32.totalorder %s485_s23, %s648_s3 }
  0x27   :  { %p491_p4 = pnand %p489_p3, %p486_p2 }
  0x29   :  { %494 = shalt.err (!%p491_p4)
}
  0x2a   :  { %s495_s28 = scalar_lea.vmem %s45_s19, 1024  ;;  %p500_p6 = scmp.lt.s32.totalorder %s45_s19, %s45_s19 }
  0x2b   :  { %p496_p5 = scmp.ne.s32.totalorder %s45_s19, %s495_s28  ;;  %p501_p7 = scmp.lt.s32.totalorder %s495_s28, %s495_s28 }
  0x2d   :  { %p502_p8 = por %p501_p7, %p500_p6 }
  0x2f   :  { %p503_p9 = pnand %p502_p8, %p496_p5 }
  0x31   :  { %506 = shalt.err (!%p503_p9)
}
  0x32   :  { %50 = dma.hbm_to_vmem [thread:$0]  %s648_s3, 1024, %s45_s19, [#allocation7], %s537_s30, %s537_s30, %s538_s6  }
  0x33   :  { %529 = dma.done.wait [#allocation4], 128  }
  0x34   :  { %530 = vsyncadd [#allocation4], 4294967168 }
  0x35   :  { %531 = dma.done.wait [#allocation7], 2048  }
  0x36   :  { %532 = vsyncadd [#allocation7], 4294965248  ;;  %v540_v0 = vmov 0.0   ;;  %vm541_vm0 = vmmov 0   ;;  %v424_v1 = vld [vmem:[#allocation6] sm:$0xff]   ;;  %v425_v2 = vld [vmem:[#allocation6 + $0x8] sm:$0xff]  }
  0x37   :  { %374 = vmatprep.subr.bf16.mxu0 %v540_v0  ;;  %390 = vmatprep.mubr.msk.bf16.mxu0 %vm541_vm0, %v540_v0  ;;  %v426_v3 = vld [vmem:[#allocation6 + $0x10] sm:$0xff]   ;;  %v433_v4 = vld [vmem:[#allocation8] sm:$0xff]   ;;  %v427_v5 = vld [vmem:[#allocation6 + $0x18] sm:$0xff]   ;;  %s542_s7 = smov [#allocation9]  }
  0x38   :  { %394 = vmatprep.subr.bf16.mxu1 %v540_v0  ;;  %410 = vmatprep.mubr.msk.bf16.mxu1 %vm541_vm0, %v540_v0  ;;  %v434_v6 = vld [vmem:[#allocation8 + $0x8] sm:$0xff]   ;;  %v428_v7 = vld [vmem:[#allocation6 + $0x20] sm:$0xff]   ;;  %v435_v8 = vld [vmem:[#allocation8 + $0x10] sm:$0xff]   ;;  %s324_s8 = sshll.u32 %s542_s7, 4  ;;  %s325_s8 = int_to_ptr.vmem [resolvable:$true] %s324_s8 }
  0x39   :  { %375 = vmatpush3.bf16.msra.mxu0 %v424_v1  ;;  %395 = vmatpush3.bf16.msra.mxu1 %v433_v4  ;;  %v429_v9 = vld [vmem:[#allocation6 + $0x28] sm:$0xff]   ;;  %v436_v10 = vld [vmem:[#allocation8 + $0x18] sm:$0xff]   ;;  %v430_v11 = vld [vmem:[#allocation6 + $0x30] sm:$0xff]   ;;  %p512_p11 = scmp.lt.s32.totalorder %s325_s8, %s325_s8 }
  0x3a   :  { %376 = vmatprep.subr.bf16.mxu0 %v540_v0  ;;  %396 = vmatprep.subr.bf16.mxu1 %v540_v0  ;;  %v437_v12 = vld [vmem:[#allocation8 + $0x20] sm:$0xff]   ;;  %v431_v13 = vld [vmem:[#allocation6 + $0x38] sm:$0xff]   ;;  %v438_v14 = vld [vmem:[#allocation8 + $0x28] sm:$0xff]  }
  0x3b   :  { %v432_v15 = vld [vmem:[#allocation3] sm:$0xff]   ;;  %v439_v16 = vld [vmem:[#allocation8 + $0x30] sm:$0xff]  }
  0x3c   :  { %v440_v17 = vld [vmem:[#allocation8 + $0x38] sm:$0xff]  }
  0x3d   :  { %377 = vmatpush3.bf16.msra.mxu0 %v425_v2  ;;  %397 = vmatpush3.bf16.msra.mxu1 %v434_v6  ;;  %v346_v18 = vld [vmem:[%s647_s2] ss:$0 sm:$0xff]  ;;  %s507_s2 = scalar_lea.vmem %s325_s8, 256 }
  0x3e   :  { %378 = vmatprep.subr.bf16.mxu0 %v540_v0  ;;  %398 = vmatprep.subr.bf16.mxu1 %v540_v0  ;;  %v347_v28 = vld [vmem:[%s649_s4] ss:$0 sm:$0xff]  ;;  %p508_p10 = scmp.ne.s32.totalorder %s325_s8, %s507_s2  ;;  %p513_p12 = scmp.lt.s32.totalorder %s507_s2, %s507_s2 }
  0x40   :  { %p514_p13 = por %p513_p12, %p512_p11 }
  0x41   :  { %379 = vmatpush3.bf16.msra.mxu0 %v426_v3  ;;  %399 = vmatpush3.bf16.msra.mxu1 %v435_v8 }
  0x42   :  { %380 = vmatprep.subr.bf16.mxu0 %v540_v0  ;;  %400 = vmatprep.subr.bf16.mxu1 %v540_v0  ;;  %p515_p0 = pnand %p514_p13, %p508_p10 }
  0x45   :  { %381 = vmatpush3.bf16.msra.mxu0 %v427_v5  ;;  %401 = vmatpush3.bf16.msra.mxu1 %v436_v10 }
  0x46   :  { %382 = vmatprep.subr.bf16.mxu0 %v540_v0  ;;  %402 = vmatprep.subr.bf16.mxu1 %v540_v0 }
  0x49   :  { %383 = vmatpush3.bf16.msra.mxu0 %v428_v7  ;;  %403 = vmatpush3.bf16.msra.mxu1 %v437_v12 }
  0x4a   :  { %384 = vmatprep.subr.bf16.mxu0 %v540_v0  ;;  %404 = vmatprep.subr.bf16.mxu1 %v540_v0 }
  0x4d   :  { %385 = vmatpush3.bf16.msra.mxu0 %v429_v9  ;;  %405 = vmatpush3.bf16.msra.mxu1 %v438_v14 }
  0x4e   :  { %386 = vmatprep.subr.bf16.mxu0 %v540_v0  ;;  %406 = vmatprep.subr.bf16.mxu1 %v540_v0 }
  0x51   :  { %387 = vmatpush3.bf16.msra.mxu0 %v430_v11  ;;  %407 = vmatpush3.bf16.msra.mxu1 %v439_v16 }
  0x52   :  { %388 = vmatprep.subr.bf16.mxu0 %v540_v0  ;;  %408 = vmatprep.subr.bf16.mxu1 %v540_v0 }
  0x55   :  { %389 = vmatpush3.bf16.msra.mxu0 %v431_v13  ;;  %409 = vmatpush3.bf16.msra.mxu1 %v440_v17 }
  0x58   :  { %391 = vmatmul.mubr.bf16.vlgmr.msra.gmra.mrb[0].mxu0 %v432_v15 }
 0x12b   :  { %v177_v19 = vpop.f32.mrb[0].mxu0 }
 0x12c   :  { %v200_v20 = vadd.f32 %v346_v18, %v177_v19  ;;  %v392_v21 = vpop.f32.mrb[1].mxu0 }
 0x12d   :  { %v180_v22 = vpop.f32.mrb[2].mxu0 }
 0x12e   :  { %v201_v23 = vadd.f32 %v346_v18, %v180_v22  ;;  %v393_v24 = vpop.f32.mrb[3].mxu0  ;;  %v202_v25 = vmax.f32 %v200_v20, 0.0 }
 0x130   :  { %v203_v26 = vmax.f32 %v201_v23, 0.0 }
 0x132   :  { %v204_v27 = vpack.c.bf16 %v203_v26, %v202_v25 }
 0x134   :  { %411 = vmatmul.mubr.bf16.vlgmr.msra.gmra.mrb[0].mxu1 %v204_v27 }
 0x207   :  { %v310_v29 = vpop.f32.mrb[0].mxu1 }
 0x208   :  { %v311_v30 = vadd.f32 %v347_v28, %v310_v29  ;;  %v412_v31 = vpop.f32.mrb[1].mxu1 }
 0x209   :  { %v313_v32 = vpop.f32.mrb[2].mxu1 }
 0x20a   :  { %317 = vst [vmem:[#allocation9] sm:$0xff] %v311_v30  ;;  %v314_v33 = vadd.f32 %v347_v28, %v313_v32  ;;  %v413_v34 = vpop.f32.mrb[3].mxu1 }
 0x20c   :  { %318 = vst [vmem:[#allocation9 + $0x8] sm:$0xff] %v314_v33 }
 0x20d   :  { %518 = shalt.err (!%p515_p0)
}
 0x20e   :  { %s519_s10 = scalar_lea.hbm %s650_s5, 256 }
 0x20f   :  { %p520_p1 = scmp.ne.s32.totalorder %s650_s5, %s519_s10  ;;  %p523_p2 = scmp.lt.u32.totalorder %s519_s10, %s650_s5 }
 0x211   :  { %p525_p3 = pnand %p523_p2, %p520_p1 }
 0x213   :  { %528 = shalt.err (!%p525_p3)
}
 0x214   :  { %s543_s15 = smov 128   ;;  %s544_s16 = smov 8  }
 0x215   :  { %330 = dma.vmem_to_hbm [thread:$0]  %s325_s8, 256, %s650_s5, [#allocation5], %s543_s15, %s543_s15, %s544_s16  }
 0x216   :  { %533 = dma.done.wait [#allocation5], 256  }
 0x217   :  { %534 = vsyncadd [#allocation5], 4294967040 }
 0x218   :  { %334 = vsyncpa [#allocation4], 1 }
 0x219   :  { %335 = vsyncpa [#allocation7], 1 }
 0x21a   :  { %336 = vsyncpa [#allocation5], 1 }

// kernel: tpu_custom_call.1
= control target key start
LH: loop header
LB: loop body
LE: loop exit
PB: predicated region body
PF: predicated region fallthrough
CT: control target
= control target key end

     0   :  { %10 = vsyncpa [#allocation4], 0  ;;  %s645_s0 = inlined_call_operand.hbm [shape: bf16[16,128], index: 0, kind: input, shape index: {}]   ;;  %s646_s1 = inlined_call_operand.hbm [shape: bf16[128,128], index: 1, kind: input, shape index: {}]   ;;  %s647_s2 = inlined_call_operand.vmem [shape: f32[1,128], index: 2, kind: input, shape index: {}]   ;;  %s648_s3 = inlined_call_operand.hbm [shape: bf16[128,128], index: 3, kind: input, shape index: {}]   ;;  %s649_s4 = inlined_call_operand.vmem [shape: f32[1,128], index: 4, kind: input, shape index: {}]   ;;  %s650_s5 = inlined_call_operand.hbm [shape: f32[16,128], index: 5, kind: output, shape index: {}]  }
   0x1   :  { %11 = vsyncpa [#allocation7], 0 }
   0x2   :  { %12 = vsyncpa [#allocation5], 0  ;;  %s535_s18 = smov [#allocation6]   ;;  %s536_s20 = smov [#allocation3]  }
   0x3   :  { %s30_s19 = sshll.u32 %s535_s18, 4  ;;  %s18_s21 = sshll.u32 %s536_s20, 4  ;;  %s31_s19 = int_to_ptr.vmem [resolvable:$true] %s30_s19  ;;  %s575_s21 = int_to_ptr.vmem [resolvable:$true] %s18_s21 }
   0x4   :  { %s441_s24 = scalar_lea.hbm %s646_s1, 1024 }
   0x5   :  { %p442_p0 = scmp.ne.s32.totalorder %s646_s1, %s441_s24  ;;  %p445_p1 = scmp.lt.u32.totalorder %s441_s24, %s646_s1 }
   0x7   :  { %p447_p2 = pnand %p445_p1, %p442_p0 }
   0x9   :  { %450 = shalt.err (!%p447_p2)
}
   0xa   :  { %s451_s29 = scalar_lea.vmem %s31_s19, 1024  ;;  %p456_p4 = scmp.lt.s32.totalorder %s31_s19, %s31_s19 }
   0xb   :  { %p452_p3 = scmp.ne.s32.totalorder %s31_s19, %s451_s29  ;;  %p457_p5 = scmp.lt.s32.totalorder %s451_s29, %s451_s29 }
   0xd   :  { %p458_p6 = por %p457_p5, %p456_p4 }
   0xf   :  { %p459_p7 = pnand %p458_p6, %p452_p3 }
  0x11   :  { %462 = shalt.err (!%p459_p7)
}
  0x12   :  { %s537_s30 = smov 64   ;;  %s538_s6 = smov 4  }
  0x13   :  { %36 = dma.hbm_to_vmem [thread:$0]  %s646_s1, 1024, %s31_s19, [#allocation7], %s537_s30, %s537_s30, %s538_s6  }
  0x14   :  { %s463_s11 = scalar_lea.hbm %s645_s0, 128 }
  0x15   :  { %p464_p8 = scmp.ne.s32.totalorder %s645_s0, %s463_s11  ;;  %p467_p9 = scmp.lt.u32.totalorder %s463_s11, %s645_s0 }
  0x17   :  { %p469_p10 = pnand %p467_p9, %p464_p8 }
  0x19   :  { %472 = shalt.err (!%p469_p10)
}
  0x1a   :  { %s473_s16 = scalar_lea.vmem %s575_s21, 128  ;;  %p478_p12 = scmp.lt.s32.totalorder %s575_s21, %s575_s21 }
  0x1b   :  { %p474_p11 = scmp.ne.s32.totalorder %s575_s21, %s473_s16  ;;  %p479_p13 = scmp.lt.s32.totalorder %s473_s16, %s473_s16 }
  0x1d   :  { %p480_p0 = por %p479_p13, %p478_p12 }
  0x1f   :  { %p481_p1 = pnand %p480_p0, %p474_p11 }
  0x21   :  { %484 = shalt.err (!%p481_p1)
}
  0x22   :  { %24 = dma.hbm_to_vmem [thread:$0]  %s645_s0, 128, %s575_s21, [#allocation4], %s537_s30, %s537_s30, %s538_s6  }
  0x23   :  { %s539_s18 = smov [#allocation8]   ;;  %s485_s23 = scalar_lea.hbm %s648_s3, 1024 }
  0x24   :  { %s44_s19 = sshll.u32 %s539_s18, 4  ;;  %p486_p2 = scmp.ne.s32.totalorder %s648_s3, %s485_s23  ;;  %s45_s19 = int_to_ptr.vmem [resolvable:$true] %s44_s19 }
  0x25   :  { %p489_p3 = scmp.lt.u32.totalorder %s485_s23, %s648_s3 }
  0x27   :  { %p491_p4 = pnand %p489_p3, %p486_p2 }
  0x29   :  { %494 = shalt.err (!%p491_p4)
}
  0x2a   :  { %s495_s28 = scalar_lea.vmem %s45_s19, 1024  ;;  %p500_p6 = scmp.lt.s32.totalorder %s45_s19, %s45_s19 }
  0x2b   :  { %p496_p5 = scmp.ne.s32.totalorder %s45_s19, %s495_s28  ;;  %p501_p7 = scmp.lt.s32.totalorder %s495_s28, %s495_s28 }
  0x2d   :  { %p502_p8 = por %p501_p7, %p500_p6 }
  0x2f   :  { %p503_p9 = pnand %p502_p8, %p496_p5 }
  0x31   :  { %506 = shalt.err (!%p503_p9)
}
  0x32   :  { %50 = dma.hbm_to_vmem [thread:$0]  %s648_s3, 1024, %s45_s19, [#allocation7], %s537_s30, %s537_s30, %s538_s6  }
  0x33   :  { %529 = dma.done.wait [#allocation4], 128  }
  0x34   :  { %530 = vsyncadd [#allocation4], 4294967168 }
  0x35   :  { %531 = dma.done.wait [#allocation7], 2048  }
  0x36   :  { %532 = vsyncadd [#allocation7], 4294965248  ;;  %v540_v0 = vmov 0.0   ;;  %vm541_vm0 = vmmov 0   ;;  %v424_v1 = vld [vmem:[#allocation6] sm:$0xff]   ;;  %v425_v2 = vld [vmem:[#allocation6 + $0x8] sm:$0xff]  }
  0x37   :  { %374 = vmatprep.subr.bf16.mxu0 %v540_v0  ;;  %390 = vmatprep.mubr.msk.bf16.mxu0 %vm541_vm0, %v540_v0  ;;  %v426_v3 = vld [vmem:[#allocation6 + $0x10] sm:$0xff]   ;;  %v433_v4 = vld [vmem:[#allocation8] sm:$0xff]   ;;  %v427_v5 = vld [vmem:[#allocation6 + $0x18] sm:$0xff]   ;;  %s542_s7 = smov [#allocation9]  }
  0x38   :  { %394 = vmatprep.subr.bf16.mxu1 %v540_v0  ;;  %410 = vmatprep.mubr.msk.bf16.mxu1 %vm541_vm0, %v540_v0  ;;  %v434_v6 = vld [vmem:[#allocation8 + $0x8] sm:$0xff]   ;;  %v428_v7 = vld [vmem:[#allocation6 + $0x20] sm:$0xff]   ;;  %v435_v8 = vld [vmem:[#allocation8 + $0x10] sm:$0xff]   ;;  %s324_s8 = sshll.u32 %s542_s7, 4  ;;  %s325_s8 = int_to_ptr.vmem [resolvable:$true] %s324_s8 }
  0x39   :  { %375 = vmatpush3.bf16.msra.mxu0 %v424_v1  ;;  %395 = vmatpush3.bf16.msra.mxu1 %v433_v4  ;;  %v429_v9 = vld [vmem:[#allocation6 + $0x28] sm:$0xff]   ;;  %v436_v10 = vld [vmem:[#allocation8 + $0x18] sm:$0xff]   ;;  %v430_v11 = vld [vmem:[#allocation6 + $0x30] sm:$0xff]   ;;  %p512_p11 = scmp.lt.s32.totalorder %s325_s8, %s325_s8 }
  0x3a   :  { %376 = vmatprep.subr.bf16.mxu0 %v540_v0  ;;  %396 = vmatprep.subr.bf16.mxu1 %v540_v0  ;;  %v437_v12 = vld [vmem:[#allocation8 + $0x20] sm:$0xff]   ;;  %v431_v13 = vld [vmem:[#allocation6 + $0x38] sm:$0xff]   ;;  %v438_v14 = vld [vmem:[#allocation8 + $0x28] sm:$0xff]  }
  0x3b   :  { %v432_v15 = vld [vmem:[#allocation3] sm:$0xff]   ;;  %v439_v16 = vld [vmem:[#allocation8 + $0x30] sm:$0xff]  }
  0x3c   :  { %v440_v17 = vld [vmem:[#allocation8 + $0x38] sm:$0xff]  }
  0x3d   :  { %377 = vmatpush3.bf16.msra.mxu0 %v425_v2  ;;  %397 = vmatpush3.bf16.msra.mxu1 %v434_v6  ;;  %v346_v18 = vld [vmem:[%s647_s2] ss:$0 sm:$0xff]  ;;  %s507_s2 = scalar_lea.vmem %s325_s8, 256 }
  0x3e   :  { %378 = vmatprep.subr.bf16.mxu0 %v540_v0  ;;  %398 = vmatprep.subr.bf16.mxu1 %v540_v0  ;;  %v347_v28 = vld [vmem:[%s649_s4] ss:$0 sm:$0xff]  ;;  %p508_p10 = scmp.ne.s32.totalorder %s325_s8, %s507_s2  ;;  %p513_p12 = scmp.lt.s32.totalorder %s507_s2, %s507_s2 }
  0x40   :  { %p514_p13 = por %p513_p12, %p512_p11 }
  0x41   :  { %379 = vmatpush3.bf16.msra.mxu0 %v426_v3  ;;  %399 = vmatpush3.bf16.msra.mxu1 %v435_v8 }
  0x42   :  { %380 = vmatprep.subr.bf16.mxu0 %v540_v0  ;;  %400 = vmatprep.subr.bf16.mxu1 %v540_v0  ;;  %p515_p0 = pnand %p514_p13, %p508_p10 }
  0x45   :  { %381 = vmatpush3.bf16.msra.mxu0 %v427_v5  ;;  %401 = vmatpush3.bf16.msra.mxu1 %v436_v10 }
  0x46   :  { %382 = vmatprep.subr.bf16.mxu0 %v540_v0  ;;  %402 = vmatprep.subr.bf16.mxu1 %v540_v0 }
  0x49   :  { %383 = vmatpush3.bf16.msra.mxu0 %v428_v7  ;;  %403 = vmatpush3.bf16.msra.mxu1 %v437_v12 }
  0x4a   :  { %384 = vmatprep.subr.bf16.mxu0 %v540_v0  ;;  %404 = vmatprep.subr.bf16.mxu1 %v540_v0 }
  0x4d   :  { %385 = vmatpush3.bf16.msra.mxu0 %v429_v9  ;;  %405 = vmatpush3.bf16.msra.mxu1 %v438_v14 }
  0x4e   :  { %386 = vmatprep.subr.bf16.mxu0 %v540_v0  ;;  %406 = vmatprep.subr.bf16.mxu1 %v540_v0 }
  0x51   :  { %387 = vmatpush3.bf16.msra.mxu0 %v430_v11  ;;  %407 = vmatpush3.bf16.msra.mxu1 %v439_v16 }
  0x52   :  { %388 = vmatprep.subr.bf16.mxu0 %v540_v0  ;;  %408 = vmatprep.subr.bf16.mxu1 %v540_v0 }
  0x55   :  { %389 = vmatpush3.bf16.msra.mxu0 %v431_v13  ;;  %409 = vmatpush3.bf16.msra.mxu1 %v440_v17 }
  0x58   :  { %391 = vmatmul.mubr.bf16.vlgmr.msra.gmra.mrb[0].mxu0 %v432_v15 }
 0x12b   :  { %v177_v19 = vpop.f32.mrb[0].mxu0 }
 0x12c   :  { %v200_v20 = vadd.f32 %v346_v18, %v177_v19  ;;  %v392_v21 = vpop.f32.mrb[1].mxu0 }
 0x12d   :  { %v180_v22 = vpop.f32.mrb[2].mxu0 }
 0x12e   :  { %v201_v23 = vadd.f32 %v346_v18, %v180_v22  ;;  %v393_v24 = vpop.f32.mrb[3].mxu0  ;;  %v202_v25 = vmax.f32 %v200_v20, 0.0 }
 0x130   :  { %v203_v26 = vmax.f32 %v201_v23, 0.0 }
 0x132   :  { %v204_v27 = vpack.c.bf16 %v203_v26, %v202_v25 }
 0x134   :  { %411 = vmatmul.mubr.bf16.vlgmr.msra.gmra.mrb[0].mxu1 %v204_v27 }
 0x207   :  { %v310_v29 = vpop.f32.mrb[0].mxu1 }
 0x208   :  { %v311_v30 = vadd.f32 %v347_v28, %v310_v29  ;;  %v412_v31 = vpop.f32.mrb[1].mxu1 }
 0x209   :  { %v313_v32 = vpop.f32.mrb[2].mxu1 }
 0x20a   :  { %317 = vst [vmem:[#allocation9] sm:$0xff] %v311_v30  ;;  %v314_v33 = vadd.f32 %v347_v28, %v313_v32  ;;  %v413_v34 = vpop.f32.mrb[3].mxu1 }
 0x20c   :  { %318 = vst [vmem:[#allocation9 + $0x8] sm:$0xff] %v314_v33 }
 0x20d   :  { %518 = shalt.err (!%p515_p0)
}
 0x20e   :  { %s519_s10 = scalar_lea.hbm %s650_s5, 256 }
 0x20f   :  { %p520_p1 = scmp.ne.s32.totalorder %s650_s5, %s519_s10  ;;  %p523_p2 = scmp.lt.u32.totalorder %s519_s10, %s650_s5 }
 0x211   :  { %p525_p3 = pnand %p523_p2, %p520_p1 }
 0x213   :  { %528 = shalt.err (!%p525_p3)
}
 0x214   :  { %s543_s15 = smov 128   ;;  %s544_s16 = smov 8  }
 0x215   :  { %330 = dma.vmem_to_hbm [thread:$0]  %s325_s8, 256, %s650_s5, [#allocation5], %s543_s15, %s543_s15, %s544_s16  }
 0x216   :  { %533 = dma.done.wait [#allocation5], 256  }
 0x217   :  { %534 = vsyncadd [#allocation5], 4294967040 }
 0x218   :  { %334 = vsyncpa [#allocation4], 1 }
 0x219   :  { %335 = vsyncpa [#allocation7], 1 }
 0x21a   :  { %336 = vsyncpa [#allocation5], 1 }

</bundles_post_ra>
